<compile_context>
chip_gen: v7x
topology: tpu7x:2x2x1
jax: 0.10.0
libtpu: 0.0.40
codegen_flags: <defaults>
</compile_context>

<pallas_src>
import functools

import jax
import jax.numpy as jnp
from jax import lax
from jax.experimental import pallas as pl
from jax.experimental.pallas import tpu as pltpu

_LANE = 128
_SUBLANE = 8


def _round_up(x, m):
    return ((x + m - 1) // m) * m


def _pad2d(a, rows, cols):
    return jnp.pad(a, ((0, rows - a.shape[0]), (0, cols - a.shape[1])))


def _device_vmem_bytes():
    try:
        return int(pltpu.get_tpu_info().vmem_capacity_bytes)
    except Exception:
        return 64 << 20   # conservative fallback: v7x per-TensorCore VMEM


def _apply_activation(y, act):
    if act == "relu":
        return jnp.maximum(y, 0.0)
    if act == "tanh":
        return jnp.tanh(y)
    if act == "hardtanh":
        return jnp.clip(y, -1.0, 1.0)
    return y  # linear readout


# ----------------------------------------------------------------------------
# Fused kernel: the whole MLP on one batch tile.
#   o_{l+1} = act( g[t]_l * (o_l @ w_l) + b[t]_l )
# refs = (w_0, ..., w_{L-1}, out_ref); gb_ref holds [g_0|b_0|g_1|b_1|...].
# ----------------------------------------------------------------------------
def _relufit_fused_kernel(x_ref, t_ref, gb_ref, *refs, n_layers, activations,
                          nt_pad, gb_offsets, layer_douts):
    o_ref = refs[n_layers]
    tb = x_ref.shape[0]

    # Per-sample task gather for ALL layers with ONE one-hot matmul against the
    # resident (Nt, sum 2*Dout) gain/bias slab (never materialized per-batch in HBM).
    t = t_ref[...]                                                   # (tb, 1) int32
    onehot = (t == lax.broadcasted_iota(jnp.int32, (tb, nt_pad), 1)).astype(jnp.float32)
    gbt = jnp.dot(onehot, gb_ref[...], preferred_element_type=jnp.float32)

    o = x_ref[...]
    for li in range(n_layers):
        w = refs[li][...]                                            # (Din_p, Dout_p)
        y = jnp.dot(o.astype(w.dtype), w, preferred_element_type=jnp.float32)
        off, d = gb_offsets[li], layer_douts[li]
        g_t = gbt[:, off:off + d]                                    # static slices
        b_t = gbt[:, off + d:off + 2 * d]
        o = _apply_activation(g_t * y + b_t, activations[li])        # f32 epilogue

    o_ref[...] = o.astype(o_ref.dtype)


# ----------------------------------------------------------------------------
# Wrapper: pads/packs params, picks the batch tile, builds specs, calls kernel.
# ----------------------------------------------------------------------------
def relufit_forward(x, t, ws, gs, bs, readout="linear", *, tb=None,
                    param_dtype=jnp.bfloat16, out_dtype=jnp.float32):
    if readout not in ("linear", "tanh", "hardtanh"):
        raise NotImplementedError(
            "The available readout activation functions are: linear, tanh and hardtanh")

    B, d_in = x.shape
    n_layers = len(ws)
    nt = bs[0].shape[0]
    nt_pad = _round_up(nt, _SUBLANE)

    dims = [d_in] + [int(w.shape[1]) for w in ws]
    # Hidden dims padded to lane width (dense MXU / vreg tiles); INPUT and FINAL
    # dims kept at their true size so HBM traffic is not inflated 4-128x.
    dims_pad = [d_in] + [_round_up(d, _LANE) for d in dims[1:-1]] + [dims[-1]]

    activations = tuple(["relu"] * (n_layers - 1) + [readout])
    x_itemsize = jnp.dtype(param_dtype).itemsize      # x streamed in param dtype
    out_itemsize = jnp.dtype(out_dtype).itemsize

    # ---- parameters --------------------------------------------------------
    # Zero-padding is exact: padded weight rows/cols and gain/bias cols are 0,
    # so padded units stay 0 through relu and contribute nothing downstream.
    w_ps, gb_blocks, gb_offsets = [], [], []
    off = 0
    for li in range(n_layers):
        din_p, dout_p = dims_pad[li], dims_pad[li + 1]
        w_ps.append(_pad2d(jnp.asarray(ws[li], jnp.float32), din_p, dout_p)
                    .astype(param_dtype))
        g_p = _pad2d(jnp.asarray(gs[li], jnp.float32), nt_pad, dout_p)
        b_p = _pad2d(jnp.asarray(bs[li], jnp.float32), nt_pad, dout_p)
        gb_blocks += [g_p, b_p]
        gb_offsets.append(off)
        off += 2 * dout_p
    total_gb = off
    gb_all = jnp.concatenate(gb_blocks, axis=1)              # (nt_pad, total_gb) f32

    param_bytes = (sum(int(w.size) * w.dtype.itemsize for w in w_ps)
                   + int(gb_all.size) * 4)

    # ---- batch tiling (VMEM-aware) ------------------------------------------
    max_dim = max(dims_pad)

    def est_vmem(tb_):
        streams = 2 * tb_ * (dims_pad[0] * x_itemsize + 4
                             + dims_pad[-1] * out_itemsize)   # x, t, out (dbl-buffered)
        acts = tb_ * (4 * max_dim + total_gb + nt_pad) * 4    # o, y, g_t, b_t, gbt, onehot
        # Conservatively count params double-buffered (covers the fallback path).
        return 2 * param_bytes + streams + acts + (4 << 20)

    vmem_cap = _device_vmem_bytes()
    vmem_budget = vmem_cap - (8 << 20)                        # headroom (v7x: 64 MiB total)
    if tb is None:
        tb = 128
        for cand in (1024, 512, 256):
            if est_vmem(cand) <= vmem_budget:
                tb = cand
                break
    tb = _round_up(min(tb, _round_up(B, _SUBLANE)), _SUBLANE)  # don't over-pad tiny batches
    # Keep >= 2 grid steps when the batch allows it (use both v7x TensorCores).
    if _round_up(B, tb) // tb < 2 and B > _SUBLANE:
        tb = _round_up(-(-B // 2), _SUBLANE)
    b_pad = _round_up(B, tb)

    # ---- inputs --------------------------------------------------------------
    x_p = _pad2d(x.astype(jnp.float32), b_pad, d_in).astype(param_dtype)
    t_p = jnp.zeros((b_pad, 1), jnp.int32).at[:B, 0].set(jnp.asarray(t, jnp.int32))

    kernel = functools.partial(
        _relufit_fused_kernel,
        n_layers=n_layers, activations=activations, nt_pad=nt_pad,
        gb_offsets=tuple(gb_offsets), layer_douts=tuple(dims_pad[1:]))

    # Advisory cost estimate so XLA schedules around the call.
    flops = 2 * b_pad * sum(dims_pad[l] * dims_pad[l + 1] for l in range(n_layers))
    flops += 2 * b_pad * nt_pad * total_gb + 3 * b_pad * sum(dims_pad[1:])
    transcendentals = b_pad * dims_pad[-1] if readout == "tanh" else 0
    bytes_accessed = (int(x_p.size) * x_itemsize + int(t_p.size) * 4 + param_bytes
                      + b_pad * dims_pad[-1] * out_itemsize)

    vmem_limit = int(min(max(est_vmem(tb), 32 << 20), vmem_budget))
    # TODO(synk): when 2*param_bytes approaches the VMEM budget (very wide layers,
    # esp. on v7x's 64 MiB), add K/N grid axes with an f32 accumulator scratch
    # instead of keeping full weight blocks resident.

    def build_call(single_buffer_params):
        kwargs = {"pipeline_mode": pl.Buffered(1)} if single_buffer_params else {}
        const_spec = lambda shape: pl.BlockSpec(shape, lambda i: (0, 0), **kwargs)
        in_specs = [
            pl.BlockSpec((tb, dims_pad[0]), lambda i: (i, 0)),     # x tile (true d_in)
            pl.BlockSpec((tb, 1), lambda i: (i, 0)),               # task ids
            const_spec((nt_pad, total_gb)),                        # [g|b] slab, resident
        ] + [const_spec((dims_pad[l], dims_pad[l + 1])) for l in range(n_layers)]
        return pl.pallas_call(
            kernel,
            out_shape=jax.ShapeDtypeStruct((b_pad, dims_pad[-1]), out_dtype),
            grid_spec=pltpu.PrefetchScalarGridSpec(
                num_scalar_prefetch=0,
                grid=(b_pad // tb,),
                in_specs=in_specs,
                out_specs=pl.BlockSpec((tb, dims_pad[-1]), lambda i: (i, 0)),
            ),
            compiler_params=pltpu.CompilerParams(
                dimension_semantics=("parallel",),
                vmem_limit_bytes=vmem_limit,
            ),
            cost_estimate=pl.CostEstimate(
                flops=int(flops), transcendentals=int(transcendentals),
                bytes_accessed=int(bytes_accessed)),
        )

    args = (x_p, t_p, gb_all, *w_ps)
    try:
        # Constant-index param blocks: single-buffer them to halve their VMEM cost.
        out_p = build_call(True)(*args)
    except Exception:
        # pipeline_mode=pl.Buffered(1) not supported by this jax version/backend:
        # fall back to default double-buffering (identical numerics, more VMEM).
        out_p = build_call(False)(*args)

    return out_p[:B]


# Pure-JAX reference (mirrors the PyTorch forward exactly).
def relufit_reference(x, t, ws, gs, bs, readout="linear"):
    o = x.astype(jnp.float32)
    n_layers = len(ws)
    for i, (w, g, b) in enumerate(zip(ws, gs, bs)):
        o = g[t, :] * (o @ w) + b[t, :]
        if i < n_layers - 1:
            o = jnp.maximum(o, 0.0)
        elif readout == "tanh":
            o = jnp.tanh(o)
        elif readout == "hardtanh":
            o = jnp.clip(o, -1.0, 1.0)
    return o


def _make_params(key, layer_dims, nt):
    n_layers = len(layer_dims) - 1
    keys = jax.random.split(key, 3 * n_layers + 2)
    kx, kt = keys[0], keys[1]
    ws, gs, bs = [], [], []
    for li in range(n_layers):
        dprev, dcur = layer_dims[li], layer_dims[li + 1]
        kw, kb, kg = keys[2 + 3 * li], keys[3 + 3 * li], keys[4 + 3 * li]
        ws.append(jax.random.normal(kw, (dprev, dcur), jnp.float32)
                  / jnp.sqrt(jnp.float32(dprev)))
        bs.append(0.1 * jax.random.normal(kb, (nt, dcur), jnp.float32))
        gs.append(1.0 + 0.1 * jax.random.normal(kg, (nt, dcur), jnp.float32))
    return kx, kt, ws, gs, bs


if __name__ == "__main__":
    key = jax.random.PRNGKey(0)
    k1, k2 = jax.random.split(key)

    # Config 1: batch=10 (not a multiple of 8) exercises batch padding and the
    # >=2-grid-step split; dims [32, 64, 32, 1].
    batch, d_in, nt = 10, 32, 4
    kx, kt, ws, gs, bs = _make_params(k1, [d_in, 64, 32, 1], nt)
    x = jax.random.normal(kx, (batch, d_in), jnp.float32)
    t = jax.random.randint(kt, (batch,), 0, nt, jnp.int32)

    # f32 params + f32 input: all readout variants, tight tolerance.
    for readout in ("linear", "tanh", "hardtanh"):
        out = jax.block_until_ready(
            relufit_forward(x, t, ws, gs, bs, readout=readout,
                            param_dtype=jnp.float32))
        ref = relufit_reference(x, t, ws, gs, bs, readout=readout)
        assert out.shape == ref.shape == (batch, 1)
        assert jnp.allclose(out, ref, atol=1e-4, rtol=1e-4), f"mismatch f32 {readout}"

    # Default path: bf16 weights + bf16 input into the MXU, f32 accumulate/epilogue.
    out_bf16 = jax.block_until_ready(
        relufit_forward(x, t, ws, gs, bs, readout="linear"))
    ref_lin = relufit_reference(x, t, ws, gs, bs, readout="linear")
    assert jnp.allclose(out_bf16, ref_lin, atol=1e-1, rtol=1e-1), "mismatch bf16"

    # Config 2: unaligned feature dims (d_in=40, hidden [100, 50]) and a larger
    # batch — exercises the unpadded-input / unpadded-readout block paths.
    batch2, d_in2, nt2 = 300, 40, 3
    kx2, kt2, ws2, gs2, bs2 = _make_params(k2, [d_in2, 100, 50, 1], nt2)
    x2 = jax.random.normal(kx2, (batch2, d_in2), jnp.float32)
    t2 = jax.random.randint(kt2, (batch2,), 0, nt2, jnp.int32)
    out2 = jax.block_until_ready(
        relufit_forward(x2, t2, ws2, gs2, bs2, readout="tanh",
                        param_dtype=jnp.float32))
    ref2 = relufit_reference(x2, t2, ws2, gs2, bs2, readout="tanh")
    assert out2.shape == ref2.shape == (batch2, 1)
    assert jnp.allclose(out2, ref2, atol=1e-4, rtol=1e-4), "mismatch config2"

    print("KERNEL_OK")
</pallas_src>

<mosaic_0001>
module attributes {stable_mosaic.version = 11 : i64} {
  func.func @_relufit_fused_kernel(%arg0: i32, %arg1: memref<8x32xf32, #tpu.memory_space<vmem>>, %arg2: memref<8x1xi32, #tpu.memory_space<vmem>>, %arg3: memref<8x514xf32, #tpu.memory_space<vmem>>, %arg4: memref<32x128xf32, #tpu.memory_space<vmem>>, %arg5: memref<128x128xf32, #tpu.memory_space<vmem>>, %arg6: memref<128x1xf32, #tpu.memory_space<vmem>>, %arg7: memref<8x1xf32, #tpu.memory_space<vmem>>) attributes {dimension_semantics = [#tpu.dimension_semantics<parallel>], iteration_bounds = array<i64: 2>, scalar_prefetch = 0 : i64, scratch_operands = 0 : i64, tpu.core_type = #tpu.core_type<tc>, window_params = [{transform_indices = @transform_0, window_bounds = array<i64: 8, 32>}, {transform_indices = @transform_1, window_bounds = array<i64: 8, 1>}, {pipeline_mode = #tpu.pipeline_mode<synchronous>, transform_indices = @transform_2, window_bounds = array<i64: 8, 514>}, {pipeline_mode = #tpu.pipeline_mode<synchronous>, transform_indices = @transform_3, window_bounds = array<i64: 32, 128>}, {pipeline_mode = #tpu.pipeline_mode<synchronous>, transform_indices = @transform_4, window_bounds = array<i64: 128, 128>}, {pipeline_mode = #tpu.pipeline_mode<synchronous>, transform_indices = @transform_5, window_bounds = array<i64: 128, 1>}, {transform_indices = @transform_6, window_bounds = array<i64: 8, 1>}]} {
    %c0 = arith.constant 0 : index
    %c0_0 = arith.constant 0 : index
    %0 = vector.load %arg2[%c0, %c0_0] : memref<8x1xi32, #tpu.memory_space<vmem>>, vector<8x1xi32>
    %1 = tpu.iota {dimensions = array<i32: 1>} : vector<8x8xi32>
    %2 = vector.broadcast %0 : vector<8x1xi32> to vector<8x8xi32>
    %3 = arith.cmpi eq, %2, %1 : vector<8x8xi32>
    %4 = arith.extui %3 : vector<8x8xi1> to vector<8x8xi32>
    %5 = arith.sitofp %4 : vector<8x8xi32> to vector<8x8xf32>
    %c0_1 = arith.constant 0 : index
    %c0_2 = arith.constant 0 : index
    %6 = vector.load %arg3[%c0_1, %c0_2] : memref<8x514xf32, #tpu.memory_space<vmem>>, vector<8x514xf32>
    %cst = arith.constant dense<0.000000e+00> : vector<8x514xf32>
    %7 = tpu.matmul %5, %6, %cst {dimension_numbers = #tpu.dot_dimension_numbers<[1], [0], [0], [1], [0, 0, 1, 1], [], []>} : vector<8x8xf32>, vector<8x514xf32>, vector<8x514xf32> -> vector<8x514xf32>
    %c0_3 = arith.constant 0 : index
    %c0_4 = arith.constant 0 : index
    %8 = vector.load %arg1[%c0_3, %c0_4] : memref<8x32xf32, #tpu.memory_space<vmem>>, vector<8x32xf32>
    %c0_5 = arith.constant 0 : index
    %c0_6 = arith.constant 0 : index
    %9 = vector.load %arg4[%c0_5, %c0_6] : memref<32x128xf32, #tpu.memory_space<vmem>>, vector<32x128xf32>
    %cst_7 = arith.constant dense<0.000000e+00> : vector<8x128xf32>
    %10 = tpu.matmul %8, %9, %cst_7 {dimension_numbers = #tpu.dot_dimension_numbers<[1], [0], [0], [1], [0, 0, 1, 1], [], []>} : vector<8x32xf32>, vector<32x128xf32>, vector<8x128xf32> -> vector<8x128xf32>
    %11 = vector.extract_strided_slice %7 {offsets = [0, 0], sizes = [8, 128], strides = [1, 1]} : vector<8x514xf32> to vector<8x128xf32>
    %12 = vector.extract_strided_slice %7 {offsets = [0, 128], sizes = [8, 128], strides = [1, 1]} : vector<8x514xf32> to vector<8x128xf32>
    %13 = arith.mulf %11, %10 : vector<8x128xf32>
    %14 = arith.addf %13, %12 : vector<8x128xf32>
    %cst_8 = arith.constant 0.000000e+00 : f32
    %15 = vector.broadcast %cst_8 : f32 to vector<8x128xf32>
    %16 = arith.maximumf %14, %15 : vector<8x128xf32>
    %c0_9 = arith.constant 0 : index
    %c0_10 = arith.constant 0 : index
    %17 = vector.load %arg5[%c0_9, %c0_10] : memref<128x128xf32, #tpu.memory_space<vmem>>, vector<128x128xf32>
    %cst_11 = arith.constant dense<0.000000e+00> : vector<8x128xf32>
    %18 = tpu.matmul %16, %17, %cst_11 {dimension_numbers = #tpu.dot_dimension_numbers<[1], [0], [0], [1], [0, 0, 1, 1], [], []>} : vector<8x128xf32>, vector<128x128xf32>, vector<8x128xf32> -> vector<8x128xf32>
    %19 = vector.extract_strided_slice %7 {offsets = [0, 256], sizes = [8, 128], strides = [1, 1]} : vector<8x514xf32> to vector<8x128xf32>
    %20 = vector.extract_strided_slice %7 {offsets = [0, 384], sizes = [8, 128], strides = [1, 1]} : vector<8x514xf32> to vector<8x128xf32>
    %21 = arith.mulf %19, %18 : vector<8x128xf32>
    %22 = arith.addf %21, %20 : vector<8x128xf32>
    %cst_12 = arith.constant 0.000000e+00 : f32
    %23 = vector.broadcast %cst_12 : f32 to vector<8x128xf32>
    %24 = arith.maximumf %22, %23 : vector<8x128xf32>
    %c0_13 = arith.constant 0 : index
    %c0_14 = arith.constant 0 : index
    %25 = vector.load %arg6[%c0_13, %c0_14] : memref<128x1xf32, #tpu.memory_space<vmem>>, vector<128x1xf32>
    %cst_15 = arith.constant dense<0.000000e+00> : vector<8x1xf32>
    %26 = tpu.matmul %24, %25, %cst_15 {dimension_numbers = #tpu.dot_dimension_numbers<[1], [0], [0], [1], [0, 0, 1, 1], [], []>} : vector<8x128xf32>, vector<128x1xf32>, vector<8x1xf32> -> vector<8x1xf32>
    %27 = vector.extract_strided_slice %7 {offsets = [0, 512], sizes = [8, 1], strides = [1, 1]} : vector<8x514xf32> to vector<8x1xf32>
    %28 = vector.extract_strided_slice %7 {offsets = [0, 513], sizes = [8, 1], strides = [1, 1]} : vector<8x514xf32> to vector<8x1xf32>
    %29 = arith.mulf %27, %26 : vector<8x1xf32>
    %30 = arith.addf %29, %28 : vector<8x1xf32>
    %c0_16 = arith.constant 0 : index
    %c0_17 = arith.constant 0 : index
    %31 = vector.load %arg7[%c0_16, %c0_17] : memref<8x1xf32, #tpu.memory_space<vmem>>, vector<8x1xf32>
    tpu.vector_store %arg7[%c0_16, %c0_17], %30 {strides = array<i32>} : memref<8x1xf32, #tpu.memory_space<vmem>>, vector<8x1xf32>,
    return
  }
  func.func @transform_0(%arg0: i32) -> (i32, i32) {
    %c0_i32 = arith.constant 0 : i32
    %c0_i32_0 = arith.constant 0 : i32
    return %arg0, %c0_i32 : i32, i32
  }
  func.func @transform_1(%arg0: i32) -> (i32, i32) {
    %c0_i32 = arith.constant 0 : i32
    %c0_i32_0 = arith.constant 0 : i32
    return %arg0, %c0_i32 : i32, i32
  }
  func.func @transform_2(%arg0: i32) -> (i32, i32) {
    %c0_i32 = arith.constant 0 : i32
    %c0_i32_0 = arith.constant 0 : i32
    %c0_i32_1 = arith.constant 0 : i32
    return %c0_i32, %c0_i32_0 : i32, i32
  }
  func.func @transform_3(%arg0: i32) -> (i32, i32) {
    %c0_i32 = arith.constant 0 : i32
    %c0_i32_0 = arith.constant 0 : i32
    %c0_i32_1 = arith.constant 0 : i32
    return %c0_i32, %c0_i32_0 : i32, i32
  }
  func.func @transform_4(%arg0: i32) -> (i32, i32) {
    %c0_i32 = arith.constant 0 : i32
    %c0_i32_0 = arith.constant 0 : i32
    %c0_i32_1 = arith.constant 0 : i32
    return %c0_i32, %c0_i32_0 : i32, i32
  }
  func.func @transform_5(%arg0: i32) -> (i32, i32) {
    %c0_i32 = arith.constant 0 : i32
    %c0_i32_0 = arith.constant 0 : i32
    %c0_i32_1 = arith.constant 0 : i32
    return %c0_i32, %c0_i32_0 : i32, i32
  }
  func.func @transform_6(%arg0: i32) -> (i32, i32) {
    %c0_i32 = arith.constant 0 : i32
    %c0_i32_0 = arith.constant 0 : i32
    return %arg0, %c0_i32 : i32, i32
  }
}

module attributes {stable_mosaic.version = 11 : i64} {
  func.func @_relufit_fused_kernel(%arg0: i32, %arg1: memref<8x32xf32, #tpu.memory_space<vmem>>, %arg2: memref<8x1xi32, #tpu.memory_space<vmem>>, %arg3: memref<8x514xf32, #tpu.memory_space<vmem>>, %arg4: memref<32x128xf32, #tpu.memory_space<vmem>>, %arg5: memref<128x128xf32, #tpu.memory_space<vmem>>, %arg6: memref<128x1xf32, #tpu.memory_space<vmem>>, %arg7: memref<8x1xf32, #tpu.memory_space<vmem>>) attributes {dimension_semantics = [#tpu.dimension_semantics<parallel>], iteration_bounds = array<i64: 2>, scalar_prefetch = 0 : i64, scratch_operands = 0 : i64, tpu.core_type = #tpu.core_type<tc>, window_params = [{transform_indices = @transform_0, window_bounds = array<i64: 8, 32>}, {transform_indices = @transform_1, window_bounds = array<i64: 8, 1>}, {pipeline_mode = #tpu.pipeline_mode<synchronous>, transform_indices = @transform_2, window_bounds = array<i64: 8, 514>}, {pipeline_mode = #tpu.pipeline_mode<synchronous>, transform_indices = @transform_3, window_bounds = array<i64: 32, 128>}, {pipeline_mode = #tpu.pipeline_mode<synchronous>, transform_indices = @transform_4, window_bounds = array<i64: 128, 128>}, {pipeline_mode = #tpu.pipeline_mode<synchronous>, transform_indices = @transform_5, window_bounds = array<i64: 128, 1>}, {transform_indices = @transform_6, window_bounds = array<i64: 8, 1>}]} {
    %c0 = arith.constant 0 : index
    %c0_0 = arith.constant 0 : index
    %0 = vector.load %arg2[%c0, %c0_0] : memref<8x1xi32, #tpu.memory_space<vmem>>, vector<8x1xi32>
    %1 = tpu.iota {dimensions = array<i32: 1>} : vector<8x8xi32>
    %2 = vector.broadcast %0 : vector<8x1xi32> to vector<8x8xi32>
    %3 = arith.cmpi eq, %2, %1 : vector<8x8xi32>
    %4 = arith.extui %3 : vector<8x8xi1> to vector<8x8xi32>
    %5 = arith.sitofp %4 : vector<8x8xi32> to vector<8x8xf32>
    %c0_1 = arith.constant 0 : index
    %c0_2 = arith.constant 0 : index
    %6 = vector.load %arg3[%c0_1, %c0_2] : memref<8x514xf32, #tpu.memory_space<vmem>>, vector<8x514xf32>
    %cst = arith.constant dense<0.000000e+00> : vector<8x514xf32>
    %7 = tpu.matmul %5, %6, %cst {dimension_numbers = #tpu.dot_dimension_numbers<[1], [0], [0], [1], [0, 0, 1, 1], [], []>} : vector<8x8xf32>, vector<8x514xf32>, vector<8x514xf32> -> vector<8x514xf32>
    %c0_3 = arith.constant 0 : index
    %c0_4 = arith.constant 0 : index
    %8 = vector.load %arg1[%c0_3, %c0_4] : memref<8x32xf32, #tpu.memory_space<vmem>>, vector<8x32xf32>
    %c0_5 = arith.constant 0 : index
    %c0_6 = arith.constant 0 : index
    %9 = vector.load %arg4[%c0_5, %c0_6] : memref<32x128xf32, #tpu.memory_space<vmem>>, vector<32x128xf32>
    %cst_7 = arith.constant dense<0.000000e+00> : vector<8x128xf32>
    %10 = tpu.matmul %8, %9, %cst_7 {dimension_numbers = #tpu.dot_dimension_numbers<[1], [0], [0], [1], [0, 0, 1, 1], [], []>} : vector<8x32xf32>, vector<32x128xf32>, vector<8x128xf32> -> vector<8x128xf32>
    %11 = vector.extract_strided_slice %7 {offsets = [0, 0], sizes = [8, 128], strides = [1, 1]} : vector<8x514xf32> to vector<8x128xf32>
    %12 = vector.extract_strided_slice %7 {offsets = [0, 128], sizes = [8, 128], strides = [1, 1]} : vector<8x514xf32> to vector<8x128xf32>
    %13 = arith.mulf %11, %10 : vector<8x128xf32>
    %14 = arith.addf %13, %12 : vector<8x128xf32>
    %cst_8 = arith.constant 0.000000e+00 : f32
    %15 = vector.broadcast %cst_8 : f32 to vector<8x128xf32>
    %16 = arith.maximumf %14, %15 : vector<8x128xf32>
    %c0_9 = arith.constant 0 : index
    %c0_10 = arith.constant 0 : index
    %17 = vector.load %arg5[%c0_9, %c0_10] : memref<128x128xf32, #tpu.memory_space<vmem>>, vector<128x128xf32>
    %cst_11 = arith.constant dense<0.000000e+00> : vector<8x128xf32>
    %18 = tpu.matmul %16, %17, %cst_11 {dimension_numbers = #tpu.dot_dimension_numbers<[1], [0], [0], [1], [0, 0, 1, 1], [], []>} : vector<8x128xf32>, vector<128x128xf32>, vector<8x128xf32> -> vector<8x128xf32>
    %19 = vector.extract_strided_slice %7 {offsets = [0, 256], sizes = [8, 128], strides = [1, 1]} : vector<8x514xf32> to vector<8x128xf32>
    %20 = vector.extract_strided_slice %7 {offsets = [0, 384], sizes = [8, 128], strides = [1, 1]} : vector<8x514xf32> to vector<8x128xf32>
    %21 = arith.mulf %19, %18 : vector<8x128xf32>
    %22 = arith.addf %21, %20 : vector<8x128xf32>
    %cst_12 = arith.constant 0.000000e+00 : f32
    %23 = vector.broadcast %cst_12 : f32 to vector<8x128xf32>
    %24 = arith.maximumf %22, %23 : vector<8x128xf32>
    %c0_13 = arith.constant 0 : index
    %c0_14 = arith.constant 0 : index
    %25 = vector.load %arg6[%c0_13, %c0_14] : memref<128x1xf32, #tpu.memory_space<vmem>>, vector<128x1xf32>
    %cst_15 = arith.constant dense<0.000000e+00> : vector<8x1xf32>
    %26 = tpu.matmul %24, %25, %cst_15 {dimension_numbers = #tpu.dot_dimension_numbers<[1], [0], [0], [1], [0, 0, 1, 1], [], []>} : vector<8x128xf32>, vector<128x1xf32>, vector<8x1xf32> -> vector<8x1xf32>
    %27 = vector.extract_strided_slice %7 {offsets = [0, 512], sizes = [8, 1], strides = [1, 1]} : vector<8x514xf32> to vector<8x1xf32>
    %28 = vector.extract_strided_slice %7 {offsets = [0, 513], sizes = [8, 1], strides = [1, 1]} : vector<8x514xf32> to vector<8x1xf32>
    %29 = arith.mulf %27, %26 : vector<8x1xf32>
    %30 = arith.addf %29, %28 : vector<8x1xf32>
    %c0_16 = arith.constant 0 : index
    %c0_17 = arith.constant 0 : index
    %31 = vector.load %arg7[%c0_16, %c0_17] : memref<8x1xf32, #tpu.memory_space<vmem>>, vector<8x1xf32>
    tpu.vector_store %arg7[%c0_16, %c0_17], %30 {strides = array<i32>} : memref<8x1xf32, #tpu.memory_space<vmem>>, vector<8x1xf32>,
    return
  }
  func.func @transform_0(%arg0: i32) -> (i32, i32) {
    %c0_i32 = arith.constant 0 : i32
    %c0_i32_0 = arith.constant 0 : i32
    return %arg0, %c0_i32 : i32, i32
  }
  func.func @transform_1(%arg0: i32) -> (i32, i32) {
    %c0_i32 = arith.constant 0 : i32
    %c0_i32_0 = arith.constant 0 : i32
    return %arg0, %c0_i32 : i32, i32
  }
  func.func @transform_2(%arg0: i32) -> (i32, i32) {
    %c0_i32 = arith.constant 0 : i32
    %c0_i32_0 = arith.constant 0 : i32
    %c0_i32_1 = arith.constant 0 : i32
    return %c0_i32, %c0_i32_0 : i32, i32
  }
  func.func @transform_3(%arg0: i32) -> (i32, i32) {
    %c0_i32 = arith.constant 0 : i32
    %c0_i32_0 = arith.constant 0 : i32
    %c0_i32_1 = arith.constant 0 : i32
    return %c0_i32, %c0_i32_0 : i32, i32
  }
  func.func @transform_4(%arg0: i32) -> (i32, i32) {
    %c0_i32 = arith.constant 0 : i32
    %c0_i32_0 = arith.constant 0 : i32
    %c0_i32_1 = arith.constant 0 : i32
    return %c0_i32, %c0_i32_0 : i32, i32
  }
  func.func @transform_5(%arg0: i32) -> (i32, i32) {
    %c0_i32 = arith.constant 0 : i32
    %c0_i32_0 = arith.constant 0 : i32
    %c0_i32_1 = arith.constant 0 : i32
    return %c0_i32, %c0_i32_0 : i32, i32
  }
  func.func @transform_6(%arg0: i32) -> (i32, i32) {
    %c0_i32 = arith.constant 0 : i32
    %c0_i32_0 = arith.constant 0 : i32
    return %arg0, %c0_i32 : i32, i32
  }
}

</mosaic_0001>

<bundles_post_ra>
// kernel: tpu_custom_call.1
= control target key start
LH: loop header
LB: loop body
LE: loop exit
PB: predicated region body
PF: predicated region fallthrough
CT: control target
= control target key end

     0   :  { %11 = vsyncpa [#allocation3], 0  ;;  %s1570_s0 = inlined_call_operand.hbm [shape: f32[16,32], index: 0, kind: input, shape index: {}]   ;;  %s1571_s1 = inlined_call_operand.vmem [shape: s32[16,1], index: 1, kind: input, shape index: {}]   ;;  %s1572_s2 = inlined_call_operand.hbm [shape: f32[8,514], index: 2, kind: input, shape index: {}]   ;;  %s1573_s3 = inlined_call_operand.vmem [shape: f32[32,128], index: 3, kind: input, shape index: {}]   ;;  %s1574_s4 = inlined_call_operand.vmem [shape: f32[128,128], index: 4, kind: input, shape index: {}]   ;;  %s1575_s5 = inlined_call_operand.vmem [shape: f32[128,1], index: 5, kind: input, shape index: {}]   ;;  %s1576_s6 = inlined_call_operand.vmem [shape: f32[16,1], index: 6, kind: output, shape index: {}]  }
   0x1   :  { %13 = vsyncpa [#allocation3 + $0x1], 0 }
   0x2   :  { %14 = vsyncpa [#allocation5], 0  ;;  %s1274_s21 = smov 0   ;;  %s1276_s22 = smov 0  }
   0x3   :  { %s1278_s23 = smov 0   ;;  %s1280_s24 = smov 0  }
   0x4 LB: > { %s1293_s25 = sadd.s32 4294967295, %s1230_s24   ;;  %p40_p0 = scmp.ne.s32.totalorder %s1222_s22, %s1218_s21  ;;  %s1230_s24 = sphi %s1280_s24, %s1595_s24   ;;  %s1226_s23 = sphi %s1278_s23, %s1594_s23   ;;  %s1222_s22 = sphi %s1276_s22, %s1593_s22   ;;  %s1218_s21 = sphi %s1274_s21, %s1592_s21  }
   0x5   : > { %p1577_p1 = scmp.eq.s32.totalorder %s1293_s25, 0  ;;  %p880_p2 = scmp.ge.s32.totalorder %s1230_s24, 1 }
   0x6   : > { %p187_p3 = scmp.lt.s32.totalorder %s1230_s24, 3  ;;  %s1232_s28 = smov [#allocation4]  }
   0x7   : > { %p1301_p4 = por %p1577_p1, %p40_p0  ;;  %s200_s29 = sshll.u32 %s1232_s28, 4  ;;  %s201_s29 = int_to_ptr.vmem [resolvable:$true] %s200_s29 }
   0x8   : > { %p1305_p5 = pnand %p880_p2, %p187_p3  ;;  %s1312_s30 = sadd.s32 1, %s1230_s24  }
   0x9   : > { %s1580_s26 = scalar_select %p1301_p4, 1, 0 }
   0xa   : > { %s1581_s27 = scalar_select %p1305_p5, 1, 0 }
   0xb   : > { %p1084_p6 = pneg %p1305_p5  ;;  %s24_s8 = ssub.s32 %s1230_s24, %s1312_s30 }
   0xc   : > { %p1322_p8 = scmp.eq.s32.totalorder %s24_s8, 0  ;;  %s27_s10 = sadd.s32 1, %s1226_s23 }
   0xd   : > { %p1316_p7 = pnand %p1084_p6, %p1577_p1  ;;  %s1134_s13 = scalar_lea.hbm %s1572_s2, 640 }
   0xe   : > { %s1583_s9 = scalar_select %p1322_p8, 1, 0 }
   0xf   : > { %p1135_p10 = scmp.ne.s32.totalorder %s1572_s2, %s1134_s13  ;;  %p1136_p11 = pneg %p1316_p7 }
  0x10   : > { %p1141_p0 = scmp.lt.u32.totalorder %s1134_s13, %s1572_s2 }
  0x11   : > { %p1137_p12 = pnand %p1136_p11, %p1135_p10 }
  0x13   : > { %p1138_p13 = pneg %p1137_p12 }
  0x15   : > { %p1143_p2 = pnand %p1141_p0, %p1138_p13 }
  0x17   : > { %1146 = shalt.err (!%p1143_p2)
}
  0x18   : > { %s1147_s18 = scalar_lea.vmem %s201_s29, 640  ;;  %p1155_p9 = scmp.lt.s32.totalorder %s201_s29, %s201_s29 }
  0x19   : > { %p1148_p3 = scmp.ne.s32.totalorder %s201_s29, %s1147_s18  ;;  %p1156_p4 = scmp.lt.s32.totalorder %s1147_s18, %s1147_s18 }
  0x1b   : > { %p1150_p6 = pnand %p1148_p3, %p1136_p11  ;;  %p1157_p5 = por %p1156_p4, %p1155_p9 }
  0x1d   : > { %p1151_p1 = pneg %p1150_p6 }
  0x1f   : > { %p1158_p8 = pnand %p1157_p5, %p1151_p1 }
  0x21   : > { %1161 = shalt.err (!%p1158_p8)
}
  0x22   : > { %1087 = dma.hbm_to_vmem [thread:$0]  (!%p1316_p7), %s1572_s2, 640, %s201_s29, [#allocation5]  }
  0x23   : > { %p1584_p10 = scmp.ne.s32.totalorder %s1583_s9, 0  ;;  %p35_p4 = scmp.eq.s32.totalorder %s1230_s24, 0 }
  0x24   : > { %p1093_p1 = scmp.lt.s32.totalorder %s1230_s24, 2  ;;  %s220_s28 = sand.u32 1, %s1226_s23  }
  0x25   : > { %s1348_s21 = scalar_select %p1584_p10, %s1226_s23, %s27_s10  }
  0x26   : > { %s884_s8 = sshll.u32 %s1230_s24, 7  ;;  %p1585_p5 = scmp.ne.s32.totalorder %s1226_s23, %s1222_s22 }
  0x27   : > { %s883_s7 = sshll.u32 %s220_s28, 3  ;;  %s1360_s13 = scalar_lea.hbm %s1570_s0, %s884_s8 }
  0x28   : > { %p36_p8 = por %p35_p4, %p1585_p5  ;;  %s224_s9 = scalar_lea.vmem [#allocation2], %s883_s7 }
  0x29   : > { %s231_s24 = sshll.u32 %s224_s9, 4  ;;  %s221_s10 = scalar_lea.sflag [#allocation3], %s220_s28  ;;  %s1366_s24 = int_to_ptr.vmem [resolvable:$true] %s231_s24 }
  0x2a   : > { %p1362_p7 = pnand %p1093_p1, %p36_p8  ;;  %s1162_s14 = scalar_lea.hbm %s1360_s13, 128 }
  0x2b   : > { %p1163_p9 = scmp.ne.s32.totalorder %s1360_s13, %s1162_s14  ;;  %s1167_s17 = scalar_lea.hbm %s1570_s0, 256 }
  0x2c   : > { %p1164_p11 = pneg %p1362_p7  ;;  %p1168_p0 = scmp.lt.u32.totalorder %s1360_s13, %s1570_s0 }
  0x2d   : > { %p1169_p2 = scmp.lt.u32.totalorder %s1167_s17, %s1162_s14  ;;  %p1171_p6 = scmp.lt.u32.totalorder %s1162_s14, %s1360_s13 }
  0x2e   : > { %p1165_p12 = pnand %p1164_p11, %p1163_p9 }
  0x2f   : > { %p1170_p3 = por %p1169_p2, %p1168_p0 }
  0x30   : > { %p1166_p13 = pneg %p1165_p12 }
  0x31   : > { %p1172_p10 = por %p1171_p6, %p1170_p3 }
  0x33   : > { %p1173_p4 = pnand %p1172_p10, %p1166_p13 }
  0x35   : > { %1176 = shalt.err (!%p1173_p4)
}
  0x36   : > { %s1177_s20 = scalar_lea.vmem %s1366_s24, 128  ;;  %s1233_s28 = smov [#allocation2]  }
  0x37   : > { %p1178_p1 = scmp.ne.s32.totalorder %s1366_s24, %s1177_s20  ;;  %s1182_s8 = sshll.u32 %s1233_s28, 4  ;;  %s1183_s8 = int_to_ptr.vmem [resolvable:$false] %s1182_s8 }
  0x38   : > { %s1184_s7 = scalar_lea.vmem %s1183_s8, 256  ;;  %p1185_p9 = scmp.lt.s32.totalorder %s1366_s24, %s1183_s8 }
  0x39   : > { %p1180_p5 = pnand %p1178_p1, %p1164_p11  ;;  %p1186_p12 = scmp.lt.s32.totalorder %s1184_s7, %s1177_s20 }
  0x3b   : > { %p1181_p8 = pneg %p1180_p5  ;;  %p1187_p0 = por %p1186_p12, %p1185_p9 }
  0x3d   : > { %p1188_p2 = pnand %p1187_p0, %p1181_p8 }
  0x3f   : > { %1191 = shalt.err (!%p1188_p2)
}
  0x40   : > { %1091 = dma.hbm_to_vmem [thread:$0]  (!%p1362_p7), %s1360_s13, 128, %s1366_s24, %s221_s10  }
  0x41   : > { %p1587_p13 = scmp.ne.s32.totalorder %s1581_s27, 0 }
  0x42   : > { %s249_s11 = sand.u32 (!%p1587_p13), 1, %s1222_s22   ;;  %p1588_p11 = scmp.ne.s32.totalorder (!%p1587_p13), %s1580_s26, 0 }
  0x43   : > { %247 = sbr.rel (%p1587_p13) target bundleno = 875 (0x36b), region = 44  ;;  %s1396_s12 = sshll.u32 (!%p1587_p13), %s249_s11, 3 }
  0x44   : > { %s250_s9 = scalar_lea.sflag (!%p1587_p13), [#allocation3], %s249_s11  ;;  %s253_s14 = scalar_lea.vmem (!%p1587_p13), [#allocation2], %s1396_s12 }
  0x4a   : > { %1209 = dma.done.wait (%p1588_p11), %s250_s9, 128  }
  0x4b   : > { %1211 = vsyncadd (%p1588_p11), %s250_s9, 4294967168  ;;  %p1589_p3 = scmp.eq.s32.totalorder %s1293_s25, 0 }
  0x4d   : > { %1213 = dma.done.wait (%p1589_p3), [#allocation5], 640   ;;  %p1590_p7 = pmov %p1589_p3 }
  0x4e   : > { %p289_p6 = scmp.lt.s32.totalorder %s1293_s25, 1  ;;  %v1234_v0 = vmov 0   ;;  %v1235_v1 = vmov 0.0   ;;  %v309_v3 = vld [vmem:[#allocation4 + $0x18] sm:$0xff]  ;;  %v307_v4 = vld [vmem:[#allocation4 + $0x8] sm:$0xff]  ;;  %v308_v5 = vld [vmem:[#allocation4 + $0x10] sm:$0xff]  ;;  %v298_v8 = vlaneseq }
  0x4f   : > { %1215 = vsyncadd (%p1590_p7), [#allocation5], 4294966656  ;;  %1133 = vset.pattern.permute.xlu0 %v1234_v0  ;;  %379 = vmatprep.mubr.f32.mxu0 %v1235_v1  ;;  %v306_v6 = vld [vmem:[#allocation4] sm:$0xff]  ;;  %v1236_v7 = vmov 0.0|0.0   ;;  %v528_v10 = vld [vmem:[%s1573_s3] sm:$0xff]  ;;  %vm311_vm0 = vcmask 64512  }
  0x50   : > { %s1597_s25 = smov (!%p289_p6, %s1293_s25), 1  ;;  %450 = vmatprep.mubr.f32.mxu1 %v1235_v1  ;;  %386 = vmatprep.subr.mxu1 %v309_v3  ;;  %v299_v9 = vand.u32 127, %v298_v8  ;;  %v529_v11 = vld [vmem:[%s1573_s3 + $0x8] sm:$0xff]  ;;  %v310_v14 = vld [vmem:[#allocation4 + $0x20] sm:$0xff]  ;;  %v531_v16 = vld [vmem:[%s1573_s3 + $0x18] sm:$0xff]  ;;  %vm1237_vm2 = vmmov 0  }
  0x51   : > { %s888_s26 = sshll.u32 %s1597_s25, 3  ;;  %315 = vmatprep.subr.mxu0 %v307_v4  ;;  %387 = vmatpush1.msra.mxu1 %v308_v5  ;;  %v1025_v13 = vpack.c.bf16 %v529_v11, %v528_v10  ;;  %v530_v15 = vld [vmem:[%s1573_s3 + $0x10] sm:$0xff]  ;;  %v609_v17 = vld [vmem:[%s1574_s4] sm:$0xff]  ;;  %v610_v18 = vld [vmem:[%s1574_s4 + $0x8] sm:$0xff]  ;;  %vm532_vm3 = vcmask 261120   ;;  %s1238_s19 = smov 127  }
  0x52   : > { %s292_s29 = scalar_lea.vmem %s1571_s1, %s888_s26  ;;  %316 = vmatpush1.msra.mxu0 %v306_v6  ;;  %1024 = vmatprep.subr.bf16.mxu1 %v1236_v7  ;;  %v1028_v20 = vpack.c.bf16 %v531_v16, %v530_v15  ;;  %v1031_v21 = vpack.c.bf16 %v610_v18, %v609_v17  ;;  %v611_v22 = vld [vmem:[%s1574_s4 + $0x10] sm:$0xff]  ;;  %v612_v23 = vld [vmem:[%s1574_s4 + $0x18] sm:$0xff]  ;;  %v527_v24 = vld [vmem:[%s253_s14] sm:$0xff]  ;;  %s296_s14 = scalar_lea.vmem %s1576_s6, %s888_s26  ;;  %vm790_vm4 = vcmask 7168  }
  0x53   : > { %v297_v2 = vld [vmem:[%s292_s29] sm:$0xff]  ;;  %938 = vmatprep.subr.mxu0 %v1235_v1  ;;  %v1034_v25 = vpack.c.bf16 %v612_v23, %v611_v22  ;;  %v614_v27 = vld [vmem:[%s1574_s4 + $0x28] sm:$0xff]  ;;  %v615_v29 = vld [vmem:[%s1574_s4 + $0x30] sm:$0xff] }
  0x54   : > { %301 = vperm.xlu0 %1133, %v297_v2   ;;  %v613_v26 = vld [vmem:[%s1574_s4 + $0x20] sm:$0xff]  ;;  %v616_v30 = vld [vmem:[%s1574_s4 + $0x38] sm:$0xff]  ;;  %v618_v33 = vld [vmem:[%s1574_s4 + $0x48] sm:$0xff] }
  0x55   : > { %v1037_v28 = vpack.c.bf16 %v614_v27, %v613_v26  ;;  %v1040_v31 = vpack.c.bf16 %v616_v30, %v615_v29  ;;  %v617_v32 = vld [vmem:[%s1574_s4 + $0x40] sm:$0xff]  ;;  %v619_v35 = vld [vmem:[%s1574_s4 + $0x50] sm:$0xff]  ;;  %v620_v36 = vld [vmem:[%s1574_s4 + $0x58] sm:$0xff] }
  0x56   : > { %v1043_v34 = vpack.c.bf16 %v618_v33, %v617_v32  ;;  %v1046_v37 = vpack.c.bf16 %v620_v36, %v619_v35  ;;  %v621_v38 = vld [vmem:[%s1574_s4 + $0x60] sm:$0xff]  ;;  %v622_v39 = vld [vmem:[%s1574_s4 + $0x68] sm:$0xff]  ;;  %v623_v41 = vld [vmem:[%s1574_s4 + $0x70] sm:$0xff] }
  0x57   : > { %v1049_v40 = vpack.c.bf16 %v622_v39, %v621_v38  ;;  %v624_v42 = vld [vmem:[%s1574_s4 + $0x78] sm:$0xff]  ;;  %v698_v44 = vld [vmem:[%s1575_s5] sm:$0xff]  ;;  %v699_v45 = vld [vmem:[%s1575_s5 + $0x8] sm:$0xff] }
  0x58   : > { %v1052_v43 = vpack.c.bf16 %v624_v42, %v623_v41  ;;  %v700_v46 = vld [vmem:[%s1575_s5 + $0x10] sm:$0xff]  ;;  %v1055_v47 = vpack.c.bf16 %v699_v45, %v698_v44  ;;  %v701_v48 = vld [vmem:[%s1575_s5 + $0x18] sm:$0xff]  ;;  %v702_v50 = vld [vmem:[%s1575_s5 + $0x20] sm:$0xff] }
  0x59   : > { %v1058_v49 = vpack.c.bf16 %v701_v48, %v700_v46  ;;  %v703_v51 = vld [vmem:[%s1575_s5 + $0x28] sm:$0xff]  ;;  %v704_v53 = vld [vmem:[%s1575_s5 + $0x30] sm:$0xff]  ;;  %v705_v54 = vld [vmem:[%s1575_s5 + $0x38] sm:$0xff] }
  0x5a   : > { %v1061_v52 = vpack.c.bf16 %v703_v51, %v702_v50  ;;  %v1064_v59 = vpack.c.bf16 %v705_v54, %v704_v53  ;;  %v706_v60 = vld [vmem:[%s1575_s5 + $0x40] sm:$0xff]  ;;  %v707_v61 = vld [vmem:[%s1575_s5 + $0x48] sm:$0xff]  ;;  %v709_v2 = vld [vmem:[%s1575_s5 + $0x58] sm:$0xff] }
  0x5b   : > { %v1067_v0 = vpack.c.bf16 %v707_v61, %v706_v60  ;;  %v710_v10 = vld [vmem:[%s1575_s5 + $0x60] sm:$0xff]  ;;  %v711_v11 = vld [vmem:[%s1575_s5 + $0x68] sm:$0xff] }
  0xd3   : > { %v302_v12 = vpop.permute.xlu0 %301 }
  0xd4   : > { %vm303_vm1 = vcmp.eq.s32.totalorder %v302_v12, %v299_v9  ;;  %v1073_v12 = vpack.c.bf16 %v711_v11, %v710_v10 }
  0xd5   : > { %v890_v19 = vsel %vm303_vm1, 1.0, %v1235_v1 }
  0xd6   : > { %891 = vmatmul.mubr.msk.f32.vlgmr.msra.gmra.mrb[0].mxu0 %vm311_vm0, %v890_v19  ;;  %892 = vmatmul.mubr.msk.f32.vlgmr.msra.gmra.mrb[0].mxu1 %vm311_vm0, %v890_v19 }
  0xd7   : > { %1026 = vmatpush3.bf16.msra.mxu1 %v1025_v13  ;;  %939 = vmatpush3.msra.mxu0 %v310_v14  ;;  %v712_v13 = vld [vmem:[%s1575_s5 + $0x70] sm:$0xff]  ;;  %v713_v14 = vld [vmem:[%s1575_s5 + $0x78] sm:$0xff] }
  0xd8   : > { %940 = vmatprep.mubr.msk.f32.mxu0 %vm1237_vm2, %v1235_v1  ;;  %1027 = vmatprep.subr.bf16.mxu1 %v1236_v7  ;;  %v1076_v15 = vpack.c.bf16 %v713_v14, %v712_v13 }
  0xd9   : > { %951 = vmatprep.mubr.msk.f32.mxu1 %vm1237_vm2, %v1235_v1  ;;  %1030 = vmatprep.subr.bf16.mxu0 %v1236_v7 }
  0xda   : > { %941 = vmatmul.mubr.msk.f32.vlgmr.msra.gmra.mrb[2].mxu0 %vm311_vm0, %v890_v19 }
  0xdb   : > { %1029 = vmatpush3.bf16.msra.mxu1 %v1028_v20  ;;  %1032 = vmatpush3.bf16.msra.mxu0 %v1031_v21 }
  0xdc   : > { %1033 = vmatprep.subr.bf16.mxu0 %v1236_v7  ;;  %986 = vmatprep.mubr.msk.f32.mxu0 %vm1237_vm2, %v1235_v1 }
  0xdd   : > { %1054 = vmatprep.subr.bf16.mxu1 %v1236_v7 }
  0xde   : > { %952 = vmatmul.mubr.msk.f32.vlgmr.msra.gmra.mrb[2].mxu1 %vm532_vm3, %v527_v24 }
  0xdf   : > { %1035 = vmatpush3.bf16.msra.mxu0 %v1034_v25  ;;  %1021 = vmatprep.mubr.msk.f32.mxu1 %vm1237_vm2, %v1235_v1  ;;  %v708_v1 = vld [vmem:[%s1575_s5 + $0x50] sm:$0xff] }
  0xe0   : > { %1036 = vmatprep.subr.bf16.mxu0 %v1236_v7  ;;  %1056 = vmatpush3.bf16.msra.mxu1 %v1055_v47  ;;  %v1070_v6 = vpack.c.bf16 %v709_v2, %v708_v1 }
  0xe1   : > { %1057 = vmatprep.subr.bf16.mxu1 %v1236_v7 }
  0xe3   : > { %1038 = vmatpush3.bf16.msra.mxu0 %v1037_v28 }
  0xe4   : > { %1039 = vmatprep.subr.bf16.mxu0 %v1236_v7  ;;  %1059 = vmatpush3.bf16.msra.mxu1 %v1058_v49 }
  0xe5   : > { %1060 = vmatprep.subr.bf16.mxu1 %v1236_v7 }
  0xe7   : > { %1041 = vmatpush3.bf16.msra.mxu0 %v1040_v31 }
  0xe8   : > { %1042 = vmatprep.subr.bf16.mxu0 %v1236_v7  ;;  %1062 = vmatpush3.bf16.msra.mxu1 %v1061_v52 }
  0xe9   : > { %1063 = vmatprep.subr.bf16.mxu1 %v1236_v7 }
  0xeb   : > { %1044 = vmatpush3.bf16.msra.mxu0 %v1043_v34 }
  0xec   : > { %1045 = vmatprep.subr.bf16.mxu0 %v1236_v7  ;;  %1065 = vmatpush3.bf16.msra.mxu1 %v1064_v59 }
  0xed   : > { %1066 = vmatprep.subr.bf16.mxu1 %v1236_v7 }
  0xef   : > { %1047 = vmatpush3.bf16.msra.mxu0 %v1046_v37 }
  0xf0   : > { %1048 = vmatprep.subr.bf16.mxu0 %v1236_v7  ;;  %1068 = vmatpush3.bf16.msra.mxu1 %v1067_v0 }
  0xf1   : > { %1069 = vmatprep.subr.bf16.mxu1 %v1236_v7 }
  0xf3   : > { %1050 = vmatpush3.bf16.msra.mxu0 %v1049_v40 }
  0xf4   : > { %1051 = vmatprep.subr.bf16.mxu0 %v1236_v7  ;;  %1071 = vmatpush3.bf16.msra.mxu1 %v1070_v6 }
  0xf5   : > { %1072 = vmatprep.subr.bf16.mxu1 %v1236_v7 }
  0xf7   : > { %1053 = vmatpush3.bf16.msra.mxu0 %v1052_v43 }
  0xf8   : > { %1074 = vmatpush3.bf16.msra.mxu1 %v1073_v12 }
  0xf9   : > { %1075 = vmatprep.subr.bf16.mxu1 %v1236_v7 }
  0xfc   : > { %1077 = vmatpush3.bf16.msra.mxu1 %v1076_v15 }
 0x1a9   : > { %v381_v55 = vpop.f32.mrb[0].mxu0  ;;  %v452_v56 = vpop.f32.mrb[0].mxu1 }
 0x1aa   : > { %v383_v57 = vpop.f32.mrb[1].mxu0  ;;  %v454_v58 = vpop.f32.mrb[1].mxu1 }
 0x1ad   : > { %v523_v62 = vpop.f32.mrb[2].mxu0 }
 0x1ae   : > { %786 = vrot.lane.b32.xlu0 %v523_v62, %s1238_s19  ;;  %v942_v63 = vpop.f32.mrb[3].mxu0 }
 0x1b1   : > { %v602_v3 = vpop.f32.mrb[2].mxu1 }
 0x1b2   : > { %v606_v4 = vmul.f32 %v602_v3, %v381_v55  ;;  %v953_v5 = vpop.f32.mrb[3].mxu1 }
 0x1b4   : > { %v607_v8 = vadd.f32 %v606_v4, %v383_v57 }
 0x1b6   : > { %v608_v9 = vmax.f32 %v607_v8, 0.0 }
 0x1b8   : > { %987 = vmatmul.mubr.f32.vlgmr.msra.gmra.mrb[4].mxu0 %v608_v9 }
 0x220   : > { %v787_v7 = vpop.permute.xlu0 %786 }
 0x28b   : > { %v691_v16 = vpop.f32.mrb[4].mxu0 }
 0x28c   : > { %v695_v17 = vmul.f32 %v691_v16, %v452_v56  ;;  %v988_v18 = vpop.f32.mrb[5].mxu0 }
 0x28e   : > { %v696_v19 = vadd.f32 %v695_v17, %v454_v58 }
 0x290   : > { %v697_v20 = vmax.f32 %v696_v19, 0.0 }
 0x292   : > { %1022 = vmatmul.mubr.f32.vlgmr.msra.gmra.mrb[4].mxu1 %v697_v20 }
 0x365   : > { %v780_v21 = vpop.f32.mrb[4].mxu1 }
 0x366   : > { %v784_v22 = vmul.f32 %v780_v21, %v523_v62  ;;  %v1023_v23 = vpop.f32.mrb[5].mxu1 }
 0x368   : > { %v789_v24 = vadd.f32 %v787_v7, %v784_v22 }
 0x36a   : > { %791 = vst.msk [vmem:[%s296_s14] sm:$0xff] %vm790_vm4, %v789_v24 }
 0x36b PF: > { %s1591_s17 = smov %s1348_s21  ;;  %p17_p10 = scmp.ge.s32.totalorder %s1312_s30, 4  }
 0x36c   : > { %s1592_s21 = smov %s1222_s22  ;;  %s1593_s22 = smov %s1226_s23 }
 0x36d   : > { %s1594_s23 = smov %s1591_s17  ;;  %s1595_s24 = smov %s1312_s30 }
 0x36e   :  { %19 = sbr.rel (!%p17_p10) target bundleno = 4 (0x4), region = 91 }
 0x375   :  { %811 = vsyncpa [#allocation3], 1 }
 0x376   :  { %813 = vsyncpa [#allocation3 + $0x1], 1 }
 0x377   :  { %814 = vsyncpa [#allocation5], 1 }

// kernel: tpu_custom_call.1
= control target key start
LH: loop header
LB: loop body
LE: loop exit
PB: predicated region body
PF: predicated region fallthrough
CT: control target
= control target key end

     0   :  { %11 = vsyncpa [#allocation3], 0  ;;  %s1570_s0 = inlined_call_operand.hbm [shape: f32[16,32], index: 0, kind: input, shape index: {}]   ;;  %s1571_s1 = inlined_call_operand.vmem [shape: s32[16,1], index: 1, kind: input, shape index: {}]   ;;  %s1572_s2 = inlined_call_operand.hbm [shape: f32[8,514], index: 2, kind: input, shape index: {}]   ;;  %s1573_s3 = inlined_call_operand.vmem [shape: f32[32,128], index: 3, kind: input, shape index: {}]   ;;  %s1574_s4 = inlined_call_operand.vmem [shape: f32[128,128], index: 4, kind: input, shape index: {}]   ;;  %s1575_s5 = inlined_call_operand.vmem [shape: f32[128,1], index: 5, kind: input, shape index: {}]   ;;  %s1576_s6 = inlined_call_operand.vmem [shape: f32[16,1], index: 6, kind: output, shape index: {}]  }
   0x1   :  { %13 = vsyncpa [#allocation3 + $0x1], 0 }
   0x2   :  { %14 = vsyncpa [#allocation5], 0  ;;  %s1274_s21 = smov 0   ;;  %s1276_s22 = smov 0  }
   0x3   :  { %s1278_s23 = smov 0   ;;  %s1280_s24 = smov 0  }
   0x4 LB: > { %s1293_s25 = sadd.s32 4294967295, %s1230_s24   ;;  %p40_p0 = scmp.ne.s32.totalorder %s1222_s22, %s1218_s21  ;;  %s1230_s24 = sphi %s1280_s24, %s1595_s24   ;;  %s1226_s23 = sphi %s1278_s23, %s1594_s23   ;;  %s1222_s22 = sphi %s1276_s22, %s1593_s22   ;;  %s1218_s21 = sphi %s1274_s21, %s1592_s21  }
   0x5   : > { %p1577_p1 = scmp.eq.s32.totalorder %s1293_s25, 0  ;;  %p880_p2 = scmp.ge.s32.totalorder %s1230_s24, 1 }
   0x6   : > { %p187_p3 = scmp.lt.s32.totalorder %s1230_s24, 3  ;;  %s1232_s28 = smov [#allocation4]  }
   0x7   : > { %p1301_p4 = por %p1577_p1, %p40_p0  ;;  %s200_s29 = sshll.u32 %s1232_s28, 4  ;;  %s201_s29 = int_to_ptr.vmem [resolvable:$true] %s200_s29 }
   0x8   : > { %p1305_p5 = pnand %p880_p2, %p187_p3  ;;  %s1312_s30 = sadd.s32 1, %s1230_s24  }
   0x9   : > { %s1580_s26 = scalar_select %p1301_p4, 1, 0 }
   0xa   : > { %s1581_s27 = scalar_select %p1305_p5, 1, 0 }
   0xb   : > { %p1084_p6 = pneg %p1305_p5  ;;  %s24_s8 = ssub.s32 %s1230_s24, %s1312_s30 }
   0xc   : > { %p1322_p8 = scmp.eq.s32.totalorder %s24_s8, 0  ;;  %s27_s10 = sadd.s32 1, %s1226_s23 }
   0xd   : > { %p1316_p7 = pnand %p1084_p6, %p1577_p1  ;;  %s1134_s13 = scalar_lea.hbm %s1572_s2, 640 }
   0xe   : > { %s1583_s9 = scalar_select %p1322_p8, 1, 0 }
   0xf   : > { %p1135_p10 = scmp.ne.s32.totalorder %s1572_s2, %s1134_s13  ;;  %p1136_p11 = pneg %p1316_p7 }
  0x10   : > { %p1141_p0 = scmp.lt.u32.totalorder %s1134_s13, %s1572_s2 }
  0x11   : > { %p1137_p12 = pnand %p1136_p11, %p1135_p10 }
  0x13   : > { %p1138_p13 = pneg %p1137_p12 }
  0x15   : > { %p1143_p2 = pnand %p1141_p0, %p1138_p13 }
  0x17   : > { %1146 = shalt.err (!%p1143_p2)
}
  0x18   : > { %s1147_s18 = scalar_lea.vmem %s201_s29, 640  ;;  %p1155_p9 = scmp.lt.s32.totalorder %s201_s29, %s201_s29 }
  0x19   : > { %p1148_p3 = scmp.ne.s32.totalorder %s201_s29, %s1147_s18  ;;  %p1156_p4 = scmp.lt.s32.totalorder %s1147_s18, %s1147_s18 }
  0x1b   : > { %p1150_p6 = pnand %p1148_p3, %p1136_p11  ;;  %p1157_p5 = por %p1156_p4, %p1155_p9 }
  0x1d   : > { %p1151_p1 = pneg %p1150_p6 }
  0x1f   : > { %p1158_p8 = pnand %p1157_p5, %p1151_p1 }
  0x21   : > { %1161 = shalt.err (!%p1158_p8)
}
  0x22   : > { %1087 = dma.hbm_to_vmem [thread:$0]  (!%p1316_p7), %s1572_s2, 640, %s201_s29, [#allocation5]  }
  0x23   : > { %p1584_p10 = scmp.ne.s32.totalorder %s1583_s9, 0  ;;  %p35_p4 = scmp.eq.s32.totalorder %s1230_s24, 0 }
  0x24   : > { %p1093_p1 = scmp.lt.s32.totalorder %s1230_s24, 2  ;;  %s220_s28 = sand.u32 1, %s1226_s23  }
  0x25   : > { %s1348_s21 = scalar_select %p1584_p10, %s1226_s23, %s27_s10  }
  0x26   : > { %s884_s8 = sshll.u32 %s1230_s24, 7  ;;  %p1585_p5 = scmp.ne.s32.totalorder %s1226_s23, %s1222_s22 }
  0x27   : > { %s883_s7 = sshll.u32 %s220_s28, 3  ;;  %s1360_s13 = scalar_lea.hbm %s1570_s0, %s884_s8 }
  0x28   : > { %p36_p8 = por %p35_p4, %p1585_p5  ;;  %s224_s9 = scalar_lea.vmem [#allocation2], %s883_s7 }
  0x29   : > { %s231_s24 = sshll.u32 %s224_s9, 4  ;;  %s221_s10 = scalar_lea.sflag [#allocation3], %s220_s28  ;;  %s1366_s24 = int_to_ptr.vmem [resolvable:$true] %s231_s24 }
  0x2a   : > { %p1362_p7 = pnand %p1093_p1, %p36_p8  ;;  %s1162_s14 = scalar_lea.hbm %s1360_s13, 128 }
  0x2b   : > { %p1163_p9 = scmp.ne.s32.totalorder %s1360_s13, %s1162_s14  ;;  %s1167_s17 = scalar_lea.hbm %s1570_s0, 256 }
  0x2c   : > { %p1164_p11 = pneg %p1362_p7  ;;  %p1168_p0 = scmp.lt.u32.totalorder %s1360_s13, %s1570_s0 }
  0x2d   : > { %p1169_p2 = scmp.lt.u32.totalorder %s1167_s17, %s1162_s14  ;;  %p1171_p6 = scmp.lt.u32.totalorder %s1162_s14, %s1360_s13 }
  0x2e   : > { %p1165_p12 = pnand %p1164_p11, %p1163_p9 }
  0x2f   : > { %p1170_p3 = por %p1169_p2, %p1168_p0 }
  0x30   : > { %p1166_p13 = pneg %p1165_p12 }
  0x31   : > { %p1172_p10 = por %p1171_p6, %p1170_p3 }
  0x33   : > { %p1173_p4 = pnand %p1172_p10, %p1166_p13 }
  0x35   : > { %1176 = shalt.err (!%p1173_p4)
}
  0x36   : > { %s1177_s20 = scalar_lea.vmem %s1366_s24, 128  ;;  %s1233_s28 = smov [#allocation2]  }
  0x37   : > { %p1178_p1 = scmp.ne.s32.totalorder %s1366_s24, %s1177_s20  ;;  %s1182_s8 = sshll.u32 %s1233_s28, 4  ;;  %s1183_s8 = int_to_ptr.vmem [resolvable:$false] %s1182_s8 }
  0x38   : > { %s1184_s7 = scalar_lea.vmem %s1183_s8, 256  ;;  %p1185_p9 = scmp.lt.s32.totalorder %s1366_s24, %s1183_s8 }
  0x39   : > { %p1180_p5 = pnand %p1178_p1, %p1164_p11  ;;  %p1186_p12 = scmp.lt.s32.totalorder %s1184_s7, %s1177_s20 }
  0x3b   : > { %p1181_p8 = pneg %p1180_p5  ;;  %p1187_p0 = por %p1186_p12, %p1185_p9 }
  0x3d   : > { %p1188_p2 = pnand %p1187_p0, %p1181_p8 }
  0x3f   : > { %1191 = shalt.err (!%p1188_p2)
}
  0x40   : > { %1091 = dma.hbm_to_vmem [thread:$0]  (!%p1362_p7), %s1360_s13, 128, %s1366_s24, %s221_s10  }
  0x41   : > { %p1587_p13 = scmp.ne.s32.totalorder %s1581_s27, 0 }
  0x42   : > { %s249_s11 = sand.u32 (!%p1587_p13), 1, %s1222_s22   ;;  %p1588_p11 = scmp.ne.s32.totalorder (!%p1587_p13), %s1580_s26, 0 }
  0x43   : > { %247 = sbr.rel (%p1587_p13) target bundleno = 875 (0x36b), region = 44  ;;  %s1396_s12 = sshll.u32 (!%p1587_p13), %s249_s11, 3 }
  0x44   : > { %s250_s9 = scalar_lea.sflag (!%p1587_p13), [#allocation3], %s249_s11  ;;  %s253_s14 = scalar_lea.vmem (!%p1587_p13), [#allocation2], %s1396_s12 }
  0x4a   : > { %1209 = dma.done.wait (%p1588_p11), %s250_s9, 128  }
  0x4b   : > { %1211 = vsyncadd (%p1588_p11), %s250_s9, 4294967168  ;;  %p1589_p3 = scmp.eq.s32.totalorder %s1293_s25, 0 }
  0x4d   : > { %1213 = dma.done.wait (%p1589_p3), [#allocation5], 640   ;;  %p1590_p7 = pmov %p1589_p3 }
  0x4e   : > { %p289_p6 = scmp.lt.s32.totalorder %s1293_s25, 1  ;;  %v1234_v0 = vmov 0   ;;  %v1235_v1 = vmov 0.0   ;;  %v309_v3 = vld [vmem:[#allocation4 + $0x18] sm:$0xff]  ;;  %v307_v4 = vld [vmem:[#allocation4 + $0x8] sm:$0xff]  ;;  %v308_v5 = vld [vmem:[#allocation4 + $0x10] sm:$0xff]  ;;  %v298_v8 = vlaneseq }
  0x4f   : > { %1215 = vsyncadd (%p1590_p7), [#allocation5], 4294966656  ;;  %1133 = vset.pattern.permute.xlu0 %v1234_v0  ;;  %379 = vmatprep.mubr.f32.mxu0 %v1235_v1  ;;  %v306_v6 = vld [vmem:[#allocation4] sm:$0xff]  ;;  %v1236_v7 = vmov 0.0|0.0   ;;  %v528_v10 = vld [vmem:[%s1573_s3] sm:$0xff]  ;;  %vm311_vm0 = vcmask 64512  }
  0x50   : > { %s1597_s25 = smov (!%p289_p6, %s1293_s25), 1  ;;  %450 = vmatprep.mubr.f32.mxu1 %v1235_v1  ;;  %386 = vmatprep.subr.mxu1 %v309_v3  ;;  %v299_v9 = vand.u32 127, %v298_v8  ;;  %v529_v11 = vld [vmem:[%s1573_s3 + $0x8] sm:$0xff]  ;;  %v310_v14 = vld [vmem:[#allocation4 + $0x20] sm:$0xff]  ;;  %v531_v16 = vld [vmem:[%s1573_s3 + $0x18] sm:$0xff]  ;;  %vm1237_vm2 = vmmov 0  }
  0x51   : > { %s888_s26 = sshll.u32 %s1597_s25, 3  ;;  %315 = vmatprep.subr.mxu0 %v307_v4  ;;  %387 = vmatpush1.msra.mxu1 %v308_v5  ;;  %v1025_v13 = vpack.c.bf16 %v529_v11, %v528_v10  ;;  %v530_v15 = vld [vmem:[%s1573_s3 + $0x10] sm:$0xff]  ;;  %v609_v17 = vld [vmem:[%s1574_s4] sm:$0xff]  ;;  %v610_v18 = vld [vmem:[%s1574_s4 + $0x8] sm:$0xff]  ;;  %vm532_vm3 = vcmask 261120   ;;  %s1238_s19 = smov 127  }
  0x52   : > { %s292_s29 = scalar_lea.vmem %s1571_s1, %s888_s26  ;;  %316 = vmatpush1.msra.mxu0 %v306_v6  ;;  %1024 = vmatprep.subr.bf16.mxu1 %v1236_v7  ;;  %v1028_v20 = vpack.c.bf16 %v531_v16, %v530_v15  ;;  %v1031_v21 = vpack.c.bf16 %v610_v18, %v609_v17  ;;  %v611_v22 = vld [vmem:[%s1574_s4 + $0x10] sm:$0xff]  ;;  %v612_v23 = vld [vmem:[%s1574_s4 + $0x18] sm:$0xff]  ;;  %v527_v24 = vld [vmem:[%s253_s14] sm:$0xff]  ;;  %s296_s14 = scalar_lea.vmem %s1576_s6, %s888_s26  ;;  %vm790_vm4 = vcmask 7168  }
  0x53   : > { %v297_v2 = vld [vmem:[%s292_s29] sm:$0xff]  ;;  %938 = vmatprep.subr.mxu0 %v1235_v1  ;;  %v1034_v25 = vpack.c.bf16 %v612_v23, %v611_v22  ;;  %v614_v27 = vld [vmem:[%s1574_s4 + $0x28] sm:$0xff]  ;;  %v615_v29 = vld [vmem:[%s1574_s4 + $0x30] sm:$0xff] }
  0x54   : > { %301 = vperm.xlu0 %1133, %v297_v2   ;;  %v613_v26 = vld [vmem:[%s1574_s4 + $0x20] sm:$0xff]  ;;  %v616_v30 = vld [vmem:[%s1574_s4 + $0x38] sm:$0xff]  ;;  %v618_v33 = vld [vmem:[%s1574_s4 + $0x48] sm:$0xff] }
  0x55   : > { %v1037_v28 = vpack.c.bf16 %v614_v27, %v613_v26  ;;  %v1040_v31 = vpack.c.bf16 %v616_v30, %v615_v29  ;;  %v617_v32 = vld [vmem:[%s1574_s4 + $0x40] sm:$0xff]  ;;  %v619_v35 = vld [vmem:[%s1574_s4 + $0x50] sm:$0xff]  ;;  %v620_v36 = vld [vmem:[%s1574_s4 + $0x58] sm:$0xff] }
  0x56   : > { %v1043_v34 = vpack.c.bf16 %v618_v33, %v617_v32  ;;  %v1046_v37 = vpack.c.bf16 %v620_v36, %v619_v35  ;;  %v621_v38 = vld [vmem:[%s1574_s4 + $0x60] sm:$0xff]  ;;  %v622_v39 = vld [vmem:[%s1574_s4 + $0x68] sm:$0xff]  ;;  %v623_v41 = vld [vmem:[%s1574_s4 + $0x70] sm:$0xff] }
  0x57   : > { %v1049_v40 = vpack.c.bf16 %v622_v39, %v621_v38  ;;  %v624_v42 = vld [vmem:[%s1574_s4 + $0x78] sm:$0xff]  ;;  %v698_v44 = vld [vmem:[%s1575_s5] sm:$0xff]  ;;  %v699_v45 = vld [vmem:[%s1575_s5 + $0x8] sm:$0xff] }
  0x58   : > { %v1052_v43 = vpack.c.bf16 %v624_v42, %v623_v41  ;;  %v700_v46 = vld [vmem:[%s1575_s5 + $0x10] sm:$0xff]  ;;  %v1055_v47 = vpack.c.bf16 %v699_v45, %v698_v44  ;;  %v701_v48 = vld [vmem:[%s1575_s5 + $0x18] sm:$0xff]  ;;  %v702_v50 = vld [vmem:[%s1575_s5 + $0x20] sm:$0xff] }
  0x59   : > { %v1058_v49 = vpack.c.bf16 %v701_v48, %v700_v46  ;;  %v703_v51 = vld [vmem:[%s1575_s5 + $0x28] sm:$0xff]  ;;  %v704_v53 = vld [vmem:[%s1575_s5 + $0x30] sm:$0xff]  ;;  %v705_v54 = vld [vmem:[%s1575_s5 + $0x38] sm:$0xff] }
  0x5a   : > { %v1061_v52 = vpack.c.bf16 %v703_v51, %v702_v50  ;;  %v1064_v59 = vpack.c.bf16 %v705_v54, %v704_v53  ;;  %v706_v60 = vld [vmem:[%s1575_s5 + $0x40] sm:$0xff]  ;;  %v707_v61 = vld [vmem:[%s1575_s5 + $0x48] sm:$0xff]  ;;  %v709_v2 = vld [vmem:[%s1575_s5 + $0x58] sm:$0xff] }
  0x5b   : > { %v1067_v0 = vpack.c.bf16 %v707_v61, %v706_v60  ;;  %v710_v10 = vld [vmem:[%s1575_s5 + $0x60] sm:$0xff]  ;;  %v711_v11 = vld [vmem:[%s1575_s5 + $0x68] sm:$0xff] }
  0xd3   : > { %v302_v12 = vpop.permute.xlu0 %301 }
  0xd4   : > { %vm303_vm1 = vcmp.eq.s32.totalorder %v302_v12, %v299_v9  ;;  %v1073_v12 = vpack.c.bf16 %v711_v11, %v710_v10 }
  0xd5   : > { %v890_v19 = vsel %vm303_vm1, 1.0, %v1235_v1 }
  0xd6   : > { %891 = vmatmul.mubr.msk.f32.vlgmr.msra.gmra.mrb[0].mxu0 %vm311_vm0, %v890_v19  ;;  %892 = vmatmul.mubr.msk.f32.vlgmr.msra.gmra.mrb[0].mxu1 %vm311_vm0, %v890_v19 }
  0xd7   : > { %1026 = vmatpush3.bf16.msra.mxu1 %v1025_v13  ;;  %939 = vmatpush3.msra.mxu0 %v310_v14  ;;  %v712_v13 = vld [vmem:[%s1575_s5 + $0x70] sm:$0xff]  ;;  %v713_v14 = vld [vmem:[%s1575_s5 + $0x78] sm:$0xff] }
  0xd8   : > { %940 = vmatprep.mubr.msk.f32.mxu0 %vm1237_vm2, %v1235_v1  ;;  %1027 = vmatprep.subr.bf16.mxu1 %v1236_v7  ;;  %v1076_v15 = vpack.c.bf16 %v713_v14, %v712_v13 }
  0xd9   : > { %951 = vmatprep.mubr.msk.f32.mxu1 %vm1237_vm2, %v1235_v1  ;;  %1030 = vmatprep.subr.bf16.mxu0 %v1236_v7 }
  0xda   : > { %941 = vmatmul.mubr.msk.f32.vlgmr.msra.gmra.mrb[2].mxu0 %vm311_vm0, %v890_v19 }
  0xdb   : > { %1029 = vmatpush3.bf16.msra.mxu1 %v1028_v20  ;;  %1032 = vmatpush3.bf16.msra.mxu0 %v1031_v21 }
  0xdc   : > { %1033 = vmatprep.subr.bf16.mxu0 %v1236_v7  ;;  %986 = vmatprep.mubr.msk.f32.mxu0 %vm1237_vm2, %v1235_v1 }
  0xdd   : > { %1054 = vmatprep.subr.bf16.mxu1 %v1236_v7 }
  0xde   : > { %952 = vmatmul.mubr.msk.f32.vlgmr.msra.gmra.mrb[2].mxu1 %vm532_vm3, %v527_v24 }
  0xdf   : > { %1035 = vmatpush3.bf16.msra.mxu0 %v1034_v25  ;;  %1021 = vmatprep.mubr.msk.f32.mxu1 %vm1237_vm2, %v1235_v1  ;;  %v708_v1 = vld [vmem:[%s1575_s5 + $0x50] sm:$0xff] }
  0xe0   : > { %1036 = vmatprep.subr.bf16.mxu0 %v1236_v7  ;;  %1056 = vmatpush3.bf16.msra.mxu1 %v1055_v47  ;;  %v1070_v6 = vpack.c.bf16 %v709_v2, %v708_v1 }
  0xe1   : > { %1057 = vmatprep.subr.bf16.mxu1 %v1236_v7 }
  0xe3   : > { %1038 = vmatpush3.bf16.msra.mxu0 %v1037_v28 }
  0xe4   : > { %1039 = vmatprep.subr.bf16.mxu0 %v1236_v7  ;;  %1059 = vmatpush3.bf16.msra.mxu1 %v1058_v49 }
  0xe5   : > { %1060 = vmatprep.subr.bf16.mxu1 %v1236_v7 }
  0xe7   : > { %1041 = vmatpush3.bf16.msra.mxu0 %v1040_v31 }
  0xe8   : > { %1042 = vmatprep.subr.bf16.mxu0 %v1236_v7  ;;  %1062 = vmatpush3.bf16.msra.mxu1 %v1061_v52 }
  0xe9   : > { %1063 = vmatprep.subr.bf16.mxu1 %v1236_v7 }
  0xeb   : > { %1044 = vmatpush3.bf16.msra.mxu0 %v1043_v34 }
  0xec   : > { %1045 = vmatprep.subr.bf16.mxu0 %v1236_v7  ;;  %1065 = vmatpush3.bf16.msra.mxu1 %v1064_v59 }
  0xed   : > { %1066 = vmatprep.subr.bf16.mxu1 %v1236_v7 }
  0xef   : > { %1047 = vmatpush3.bf16.msra.mxu0 %v1046_v37 }
  0xf0   : > { %1048 = vmatprep.subr.bf16.mxu0 %v1236_v7  ;;  %1068 = vmatpush3.bf16.msra.mxu1 %v1067_v0 }
  0xf1   : > { %1069 = vmatprep.subr.bf16.mxu1 %v1236_v7 }
  0xf3   : > { %1050 = vmatpush3.bf16.msra.mxu0 %v1049_v40 }
  0xf4   : > { %1051 = vmatprep.subr.bf16.mxu0 %v1236_v7  ;;  %1071 = vmatpush3.bf16.msra.mxu1 %v1070_v6 }
  0xf5   : > { %1072 = vmatprep.subr.bf16.mxu1 %v1236_v7 }
  0xf7   : > { %1053 = vmatpush3.bf16.msra.mxu0 %v1052_v43 }
  0xf8   : > { %1074 = vmatpush3.bf16.msra.mxu1 %v1073_v12 }
  0xf9   : > { %1075 = vmatprep.subr.bf16.mxu1 %v1236_v7 }
  0xfc   : > { %1077 = vmatpush3.bf16.msra.mxu1 %v1076_v15 }
 0x1a9   : > { %v381_v55 = vpop.f32.mrb[0].mxu0  ;;  %v452_v56 = vpop.f32.mrb[0].mxu1 }
 0x1aa   : > { %v383_v57 = vpop.f32.mrb[1].mxu0  ;;  %v454_v58 = vpop.f32.mrb[1].mxu1 }
 0x1ad   : > { %v523_v62 = vpop.f32.mrb[2].mxu0 }
 0x1ae   : > { %786 = vrot.lane.b32.xlu0 %v523_v62, %s1238_s19  ;;  %v942_v63 = vpop.f32.mrb[3].mxu0 }
 0x1b1   : > { %v602_v3 = vpop.f32.mrb[2].mxu1 }
 0x1b2   : > { %v606_v4 = vmul.f32 %v602_v3, %v381_v55  ;;  %v953_v5 = vpop.f32.mrb[3].mxu1 }
 0x1b4   : > { %v607_v8 = vadd.f32 %v606_v4, %v383_v57 }
 0x1b6   : > { %v608_v9 = vmax.f32 %v607_v8, 0.0 }
 0x1b8   : > { %987 = vmatmul.mubr.f32.vlgmr.msra.gmra.mrb[4].mxu0 %v608_v9 }
 0x220   : > { %v787_v7 = vpop.permute.xlu0 %786 }
 0x28b   : > { %v691_v16 = vpop.f32.mrb[4].mxu0 }
 0x28c   : > { %v695_v17 = vmul.f32 %v691_v16, %v452_v56  ;;  %v988_v18 = vpop.f32.mrb[5].mxu0 }
 0x28e   : > { %v696_v19 = vadd.f32 %v695_v17, %v454_v58 }
 0x290   : > { %v697_v20 = vmax.f32 %v696_v19, 0.0 }
 0x292   : > { %1022 = vmatmul.mubr.f32.vlgmr.msra.gmra.mrb[4].mxu1 %v697_v20 }
 0x365   : > { %v780_v21 = vpop.f32.mrb[4].mxu1 }
 0x366   : > { %v784_v22 = vmul.f32 %v780_v21, %v523_v62  ;;  %v1023_v23 = vpop.f32.mrb[5].mxu1 }
 0x368   : > { %v789_v24 = vadd.f32 %v787_v7, %v784_v22 }
 0x36a   : > { %791 = vst.msk [vmem:[%s296_s14] sm:$0xff] %vm790_vm4, %v789_v24 }
 0x36b PF: > { %s1591_s17 = smov %s1348_s21  ;;  %p17_p10 = scmp.ge.s32.totalorder %s1312_s30, 4  }
 0x36c   : > { %s1592_s21 = smov %s1222_s22  ;;  %s1593_s22 = smov %s1226_s23 }
 0x36d   : > { %s1594_s23 = smov %s1591_s17  ;;  %s1595_s24 = smov %s1312_s30 }
 0x36e   :  { %19 = sbr.rel (!%p17_p10) target bundleno = 4 (0x4), region = 91 }
 0x375   :  { %811 = vsyncpa [#allocation3], 1 }
 0x376   :  { %813 = vsyncpa [#allocation3 + $0x1], 1 }
 0x377   :  { %814 = vsyncpa [#allocation5], 1 }

</bundles_post_ra>
